<compile_context>
chip_gen: v6e
topology: v6e:2x2x1
jax: 0.10.0
libtpu: 0.0.40
codegen_flags: <defaults>
</compile_context>

<pallas_src>
import jax
import jax.numpy as jnp
import numpy as np
from jax.experimental import pallas as pl
from jax.experimental.pallas import tpu as pltpu


def lstm_kernel(x_ref, p_ref, pred_ref):
    seq, in_pad = x_ref.shape           # x_aug: (seq, in_pad), bias column included
    four_h = p_ref.shape[1]
    H = four_h // 4
    out = pred_ref.shape[1]

    # Row offsets inside the packed parameter slab.
    r_whh = in_pad                      # Whh block:  rows [in_pad, in_pad+H)
    r_wlin = r_whh + H                  # Wlin block: rows [r_wlin, r_wlin+out*seq)
    r_blin = r_wlin + out * seq         # blin row:   row  r_blin

    # ---- loop-invariant work, hoisted off the serial path -------------------
    whh = p_ref[r_whh:r_wlin, :]                       # (H, 4H), resident in vregs
    eye = jnp.eye(H, dtype=jnp.float32)                # (H, H) mask for lane->sublane move
    # Input projection (+ folded bias) for all timesteps: one MXU matmul.
    xproj = jnp.dot(x_ref[...], p_ref[0:in_pad, :],
                    preferred_element_type=jnp.float32)    # (seq, 4H)

    h = jnp.zeros((1, H), jnp.float32)      # h0 (carried in vregs)
    c = jnp.zeros((1, H), jnp.float32)      # c0 (carried in vregs)
    h_rows = []

    # seq is static & small -> fully unroll; per-step serial work is a handful of
    # VPU/XLU ops plus two EUP passes (sigmoid over gates, tanh(c)).  No MXU.
    for t in range(seq):
        # h @ Whh on VPU/XLU: identity-mask transpose of h, then broadcast-mult + reduce.
        h_col = jnp.sum(eye * h, axis=1, keepdims=True)        # (H, 1)  == h^T
        rec = jnp.sum(h_col * whh, axis=0, keepdims=True)      # (1, 4H) == h @ Whh
        gates = xproj[t:t + 1, :] + rec                        # (1, 4H)

        sig = jax.nn.sigmoid(gates)          # single full-width EUP pass
        i_g = sig[:, 0 * H:1 * H]
        f_g = sig[:, 1 * H:2 * H]
        g_g = 2.0 * sig[:, 2 * H:3 * H] - 1.0   # tanh(g) = 2*sigmoid(2g)-1 (g-cols pre-scaled)
        o_g = sig[:, 3 * H:4 * H]

        c = f_g * c + i_g * g_g
        h = o_g * jnp.tanh(c)
        h_rows.append(h)

    # ---- flattened Linear head: lane-dense VPU multiply-reduce --------------
    h_stack = jnp.concatenate(h_rows, axis=0)                  # (seq, H)
    cols = []
    for o in range(out):
        w_o = p_ref[r_wlin + o * seq:r_wlin + (o + 1) * seq, 0:H]   # (seq, H)
        s = jnp.sum(h_stack * w_o, axis=0, keepdims=True)      # (1, H)  sublane reduce
        cols.append(jnp.sum(s, axis=1, keepdims=True))         # (1, 1)  lane reduce
    row = cols[0] if out == 1 else jnp.concatenate(cols, axis=1)
    pred_ref[...] = row + p_ref[r_blin:r_blin + 1, 0:out]      # (1, out)


def lstm_predict(x, w_ih, w_hh, b_ih, b_hh, w_lin, b_lin):
    """x: (seq_len, input_size); PyTorch-shaped params; returns (1, output_size)."""
    x = jnp.asarray(x, jnp.float32)
    seq_len, in_size = x.shape
    four_h = w_ih.shape[0]
    H = four_h // 4
    out_size = w_lin.shape[0]
    assert w_lin.shape[1] == seq_len * H

    in_pad = ((in_size + 1 + 7) // 8) * 8   # (input + bias column) rows, padded to a sublane tile

    # Pre-scale g-gate columns by 2 so the kernel recovers tanh(g) = 2*sigmoid(2g)-1
    # from a single sigmoid pass.
    gscale = jnp.ones((1, four_h), jnp.float32).at[0, 2 * H:3 * H].set(2.0)

    wih_t = jnp.asarray(w_ih, jnp.float32).T                        # (in, 4H)
    b = (jnp.asarray(b_ih, jnp.float32)
         + jnp.asarray(b_hh, jnp.float32)).reshape(1, four_h)       # (1, 4H)
    wih_blk = jnp.zeros((in_pad, four_h), jnp.float32)
    wih_blk = wih_blk.at[:in_size + 1, :].set(
        jnp.concatenate([wih_t, b], axis=0) * gscale)               # bias folded as extra row

    whh_blk = jnp.asarray(w_hh, jnp.float32).T * gscale             # (H, 4H)

    # Flattened Linear weights as lane-dense (out*seq, H) rows (padded to 4H lanes).
    wlin2d = jnp.asarray(w_lin, jnp.float32).reshape(out_size * seq_len, H)
    wlin_blk = jnp.zeros((out_size * seq_len, four_h), jnp.float32).at[:, :H].set(wlin2d)

    blin_blk = jnp.zeros((1, four_h), jnp.float32).at[0, :out_size].set(
        jnp.asarray(b_lin, jnp.float32))

    # One packed parameter slab -> one DMA.
    slab = jnp.concatenate([wih_blk, whh_blk, wlin_blk, blin_blk], axis=0)

    # x with a ones column (for the folded bias), zero-padded to in_pad lanes.
    x_aug = jnp.zeros((seq_len, in_pad), jnp.float32)
    x_aug = x_aug.at[:, :in_size].set(x).at[:, in_size].set(1.0)

    vmem = pl.BlockSpec(memory_space=pltpu.MemorySpace.VMEM)
    # Gridless, whole-array VMEM: the problem is tiny and latency-bound.
    # TODO(synk): for batched inference (many independent sequences) add a leading
    # batch grid axis with dimension_semantics=("parallel",) so both v7x TensorCores
    # are used; at batch=1 that would be pure overhead, so it is omitted here.
    return pl.pallas_call(
        lstm_kernel,
        out_shape=jax.ShapeDtypeStruct((1, out_size), jnp.float32),
        in_specs=[vmem, vmem],
        out_specs=vmem,
    )(x_aug, slab)


def lstm_reference(x, w_ih, w_hh, b_ih, b_hh, w_lin, b_lin):
    """Pure-JAX reference mirroring the PyTorch forward (zero initial state)."""
    seq_len, _ = x.shape
    H = w_hh.shape[1]
    h = jnp.zeros((1, H), jnp.float32)
    c = jnp.zeros((1, H), jnp.float32)
    outs = []
    for t in range(seq_len):
        g = x[t:t + 1] @ w_ih.T + h @ w_hh.T + b_ih + b_hh
        i_g = jax.nn.sigmoid(g[:, 0 * H:1 * H])
        f_g = jax.nn.sigmoid(g[:, 1 * H:2 * H])
        g_g = jnp.tanh(g[:, 2 * H:3 * H])
        o_g = jax.nn.sigmoid(g[:, 3 * H:4 * H])
        c = f_g * c + i_g * g_g
        h = o_g * jnp.tanh(c)
        outs.append(h)
    flat = jnp.concatenate(outs, axis=0).reshape(1, -1)   # == lstm_out.reshape(1, -1)
    return flat @ w_lin.T + b_lin


if __name__ == "__main__":
    # Small, deterministic config consistent with the module:
    # input_size=4, hidden_layer=32, output_size=1, n_input (= seq_len) = 8.
    # TODO(synk): the PyTorch module carries self.hidden_cell across forward
    # calls; here a single forward from the zero initial state is implemented.
    input_size, H, output_size, seq_len = 4, 32, 1, 8

    key = jax.random.PRNGKey(0)
    ks = jax.random.split(key, 7)
    k = 1.0 / np.sqrt(H)

    x = jax.random.normal(ks[0], (seq_len, input_size), jnp.float32)   # (seq,1,in) w/ batch squeezed
    w_ih = jax.random.uniform(ks[1], (4 * H, input_size), jnp.float32, -k, k)
    w_hh = jax.random.uniform(ks[2], (4 * H, H), jnp.float32, -k, k)
    b_ih = jax.random.uniform(ks[3], (4 * H,), jnp.float32, -k, k)
    b_hh = jax.random.uniform(ks[4], (4 * H,), jnp.float32, -k, k)
    w_lin = jax.random.uniform(ks[5], (output_size, H * seq_len), jnp.float32, -k, k)
    b_lin = jax.random.uniform(ks[6], (output_size,), jnp.float32, -k, k)

    pred = lstm_predict(x, w_ih, w_hh, b_ih, b_hh, w_lin, b_lin)
    pred = jax.block_until_ready(pred)

    ref = lstm_reference(x, w_ih, w_hh, b_ih, b_hh, w_lin, b_lin)
    np.testing.assert_allclose(np.asarray(pred), np.asarray(ref), rtol=1e-5, atol=1e-5)

    print("KERNEL_OK")
</pallas_src>

<mosaic_0001>
module attributes {stable_mosaic.version = 11 : i64} {
  func.func @lstm_kernel(%arg0: memref<8x8xf32, #tpu.memory_space<vmem>>, %arg1: memref<49x128xf32, #tpu.memory_space<vmem>>, %arg2: memref<1x1xf32, #tpu.memory_space<vmem>>) attributes {dimension_semantics = [], scalar_prefetch = 0 : i64, scratch_operands = 0 : i64, tpu.core_type = #tpu.core_type<tc>} {
    %c8 = arith.constant 8 : index
    %c0 = arith.constant 0 : index
    %0 = vector.load %arg1[%c8, %c0] : memref<49x128xf32, #tpu.memory_space<vmem>>, vector<32x128xf32>
    %1 = tpu.iota {dimensions = array<i32: 0>} : vector<32x32xi32>
    %2 = tpu.iota {dimensions = array<i32: 1>} : vector<32x32xi32>
    %c0_i32 = arith.constant 0 : i32
    %3 = vector.broadcast %c0_i32 : i32 to vector<32x32xi32>
    %4 = arith.addi %1, %3 : vector<32x32xi32>
    %5 = arith.cmpi eq, %4, %2 : vector<32x32xi32>
    %6 = arith.extui %5 : vector<32x32xi1> to vector<32x32xi32>
    %7 = arith.sitofp %6 : vector<32x32xi32> to vector<32x32xf32>
    %c0_0 = arith.constant 0 : index
    %c0_1 = arith.constant 0 : index
    %8 = vector.load %arg0[%c0_0, %c0_1] : memref<8x8xf32, #tpu.memory_space<vmem>>, vector<8x8xf32>
    %c0_2 = arith.constant 0 : index
    %c0_3 = arith.constant 0 : index
    %9 = vector.load %arg1[%c0_2, %c0_3] : memref<49x128xf32, #tpu.memory_space<vmem>>, vector<8x128xf32>
    %cst = arith.constant dense<0.000000e+00> : vector<8x128xf32>
    %10 = tpu.matmul %8, %9, %cst {dimension_numbers = #tpu.dot_dimension_numbers<[1], [0], [0], [1], [0, 0, 1, 1], [], []>} : vector<8x8xf32>, vector<8x128xf32>, vector<8x128xf32> -> vector<8x128xf32>
    %cst_4 = arith.constant 0.000000e+00 : f32
    %11 = vector.broadcast %cst_4 : f32 to vector<1x32xf32>
    %cst_5 = arith.constant 0.000000e+00 : f32
    %12 = vector.broadcast %cst_5 : f32 to vector<1x32xf32>
    %13 = vector.broadcast %11 : vector<1x32xf32> to vector<32x32xf32>
    %14 = arith.mulf %7, %13 : vector<32x32xf32>
    %cst_6 = arith.constant dense<0.000000e+00> : vector<32xf32>
    %15 = vector.multi_reduction <add>, %14, %cst_6 [1] : vector<32x32xf32> to vector<32xf32>
    %16 = vector.shape_cast %15 : vector<32xf32> to vector<32x1xf32>
    %17 = vector.broadcast %16 : vector<32x1xf32> to vector<32x128xf32>
    %18 = arith.mulf %17, %0 : vector<32x128xf32>
    %cst_7 = arith.constant dense<0.000000e+00> : vector<128xf32>
    %19 = vector.multi_reduction <add>, %18, %cst_7 [0] : vector<32x128xf32> to vector<128xf32>
    %20 = vector.shape_cast %19 : vector<128xf32> to vector<1x128xf32>
    %21 = vector.extract_strided_slice %10 {offsets = [0, 0], sizes = [1, 128], strides = [1, 1]} : vector<8x128xf32> to vector<1x128xf32>
    %22 = arith.addf %21, %20 : vector<1x128xf32>
    %23 = arith.negf %22 : vector<1x128xf32>
    %24 = math.exp %23 : vector<1x128xf32>
    %cst_8 = arith.constant 1.000000e+00 : f32
    %25 = vector.broadcast %cst_8 : f32 to vector<1x128xf32>
    %26 = arith.addf %25, %24 : vector<1x128xf32>
    %27 = arith.divf %25, %26 : vector<1x128xf32>
    %28 = vector.extract_strided_slice %27 {offsets = [0, 0], sizes = [1, 32], strides = [1, 1]} : vector<1x128xf32> to vector<1x32xf32>
    %29 = vector.extract_strided_slice %27 {offsets = [0, 32], sizes = [1, 32], strides = [1, 1]} : vector<1x128xf32> to vector<1x32xf32>
    %30 = vector.extract_strided_slice %27 {offsets = [0, 64], sizes = [1, 32], strides = [1, 1]} : vector<1x128xf32> to vector<1x32xf32>
    %cst_9 = arith.constant 2.000000e+00 : f32
    %31 = vector.broadcast %cst_9 : f32 to vector<1x32xf32>
    %32 = arith.mulf %31, %30 : vector<1x32xf32>
    %cst_10 = arith.constant 1.000000e+00 : f32
    %33 = vector.broadcast %cst_10 : f32 to vector<1x32xf32>
    %34 = arith.subf %32, %33 : vector<1x32xf32>
    %35 = vector.extract_strided_slice %27 {offsets = [0, 96], sizes = [1, 32], strides = [1, 1]} : vector<1x128xf32> to vector<1x32xf32>
    %36 = arith.mulf %29, %12 : vector<1x32xf32>
    %37 = arith.mulf %28, %34 : vector<1x32xf32>
    %38 = arith.addf %36, %37 : vector<1x32xf32>
    %39 = math.tanh %38 : vector<1x32xf32>
    %40 = arith.mulf %35, %39 : vector<1x32xf32>
    %41 = vector.broadcast %40 : vector<1x32xf32> to vector<32x32xf32>
    %42 = arith.mulf %7, %41 : vector<32x32xf32>
    %cst_11 = arith.constant dense<0.000000e+00> : vector<32xf32>
    %43 = vector.multi_reduction <add>, %42, %cst_11 [1] : vector<32x32xf32> to vector<32xf32>
    %44 = vector.shape_cast %43 : vector<32xf32> to vector<32x1xf32>
    %45 = vector.broadcast %44 : vector<32x1xf32> to vector<32x128xf32>
    %46 = arith.mulf %45, %0 : vector<32x128xf32>
    %cst_12 = arith.constant dense<0.000000e+00> : vector<128xf32>
    %47 = vector.multi_reduction <add>, %46, %cst_12 [0] : vector<32x128xf32> to vector<128xf32>
    %48 = vector.shape_cast %47 : vector<128xf32> to vector<1x128xf32>
    %49 = vector.extract_strided_slice %10 {offsets = [1, 0], sizes = [1, 128], strides = [1, 1]} : vector<8x128xf32> to vector<1x128xf32>
    %50 = arith.addf %49, %48 : vector<1x128xf32>
    %51 = arith.negf %50 : vector<1x128xf32>
    %52 = math.exp %51 : vector<1x128xf32>
    %cst_13 = arith.constant 1.000000e+00 : f32
    %53 = vector.broadcast %cst_13 : f32 to vector<1x128xf32>
    %54 = arith.addf %53, %52 : vector<1x128xf32>
    %55 = arith.divf %53, %54 : vector<1x128xf32>
    %56 = vector.extract_strided_slice %55 {offsets = [0, 0], sizes = [1, 32], strides = [1, 1]} : vector<1x128xf32> to vector<1x32xf32>
    %57 = vector.extract_strided_slice %55 {offsets = [0, 32], sizes = [1, 32], strides = [1, 1]} : vector<1x128xf32> to vector<1x32xf32>
    %58 = vector.extract_strided_slice %55 {offsets = [0, 64], sizes = [1, 32], strides = [1, 1]} : vector<1x128xf32> to vector<1x32xf32>
    %cst_14 = arith.constant 2.000000e+00 : f32
    %59 = vector.broadcast %cst_14 : f32 to vector<1x32xf32>
    %60 = arith.mulf %59, %58 : vector<1x32xf32>
    %cst_15 = arith.constant 1.000000e+00 : f32
    %61 = vector.broadcast %cst_15 : f32 to vector<1x32xf32>
    %62 = arith.subf %60, %61 : vector<1x32xf32>
    %63 = vector.extract_strided_slice %55 {offsets = [0, 96], sizes = [1, 32], strides = [1, 1]} : vector<1x128xf32> to vector<1x32xf32>
    %64 = arith.mulf %57, %38 : vector<1x32xf32>
    %65 = arith.mulf %56, %62 : vector<1x32xf32>
    %66 = arith.addf %64, %65 : vector<1x32xf32>
    %67 = math.tanh %66 : vector<1x32xf32>
    %68 = arith.mulf %63, %67 : vector<1x32xf32>
    %69 = vector.broadcast %68 : vector<1x32xf32> to vector<32x32xf32>
    %70 = arith.mulf %7, %69 : vector<32x32xf32>
    %cst_16 = arith.constant dense<0.000000e+00> : vector<32xf32>
    %71 = vector.multi_reduction <add>, %70, %cst_16 [1] : vector<32x32xf32> to vector<32xf32>
    %72 = vector.shape_cast %71 : vector<32xf32> to vector<32x1xf32>
    %73 = vector.broadcast %72 : vector<32x1xf32> to vector<32x128xf32>
    %74 = arith.mulf %73, %0 : vector<32x128xf32>
    %cst_17 = arith.constant dense<0.000000e+00> : vector<128xf32>
    %75 = vector.multi_reduction <add>, %74, %cst_17 [0] : vector<32x128xf32> to vector<128xf32>
    %76 = vector.shape_cast %75 : vector<128xf32> to vector<1x128xf32>
    %77 = vector.extract_strided_slice %10 {offsets = [2, 0], sizes = [1, 128], strides = [1, 1]} : vector<8x128xf32> to vector<1x128xf32>
    %78 = arith.addf %77, %76 : vector<1x128xf32>
    %79 = arith.negf %78 : vector<1x128xf32>
    %80 = math.exp %79 : vector<1x128xf32>
    %cst_18 = arith.constant 1.000000e+00 : f32
    %81 = vector.broadcast %cst_18 : f32 to vector<1x128xf32>
    %82 = arith.addf %81, %80 : vector<1x128xf32>
    %83 = arith.divf %81, %82 : vector<1x128xf32>
    %84 = vector.extract_strided_slice %83 {offsets = [0, 0], sizes = [1, 32], strides = [1, 1]} : vector<1x128xf32> to vector<1x32xf32>
    %85 = vector.extract_strided_slice %83 {offsets = [0, 32], sizes = [1, 32], strides = [1, 1]} : vector<1x128xf32> to vector<1x32xf32>
    %86 = vector.extract_strided_slice %83 {offsets = [0, 64], sizes = [1, 32], strides = [1, 1]} : vector<1x128xf32> to vector<1x32xf32>
    %cst_19 = arith.constant 2.000000e+00 : f32
    %87 = vector.broadcast %cst_19 : f32 to vector<1x32xf32>
    %88 = arith.mulf %87, %86 : vector<1x32xf32>
    %cst_20 = arith.constant 1.000000e+00 : f32
    %89 = vector.broadcast %cst_20 : f32 to vector<1x32xf32>
    %90 = arith.subf %88, %89 : vector<1x32xf32>
    %91 = vector.extract_strided_slice %83 {offsets = [0, 96], sizes = [1, 32], strides = [1, 1]} : vector<1x128xf32> to vector<1x32xf32>
    %92 = arith.mulf %85, %66 : vector<1x32xf32>
    %93 = arith.mulf %84, %90 : vector<1x32xf32>
    %94 = arith.addf %92, %93 : vector<1x32xf32>
    %95 = math.tanh %94 : vector<1x32xf32>
    %96 = arith.mulf %91, %95 : vector<1x32xf32>
    %97 = vector.broadcast %96 : vector<1x32xf32> to vector<32x32xf32>
    %98 = arith.mulf %7, %97 : vector<32x32xf32>
    %cst_21 = arith.constant dense<0.000000e+00> : vector<32xf32>
    %99 = vector.multi_reduction <add>, %98, %cst_21 [1] : vector<32x32xf32> to vector<32xf32>
    %100 = vector.shape_cast %99 : vector<32xf32> to vector<32x1xf32>
    %101 = vector.broadcast %100 : vector<32x1xf32> to vector<32x128xf32>
    %102 = arith.mulf %101, %0 : vector<32x128xf32>
    %cst_22 = arith.constant dense<0.000000e+00> : vector<128xf32>
    %103 = vector.multi_reduction <add>, %102, %cst_22 [0] : vector<32x128xf32> to vector<128xf32>
    %104 = vector.shape_cast %103 : vector<128xf32> to vector<1x128xf32>
    %105 = vector.extract_strided_slice %10 {offsets = [3, 0], sizes = [1, 128], strides = [1, 1]} : vector<8x128xf32> to vector<1x128xf32>
    %106 = arith.addf %105, %104 : vector<1x128xf32>
    %107 = arith.negf %106 : vector<1x128xf32>
    %108 = math.exp %107 : vector<1x128xf32>
    %cst_23 = arith.constant 1.000000e+00 : f32
    %109 = vector.broadcast %cst_23 : f32 to vector<1x128xf32>
    %110 = arith.addf %109, %108 : vector<1x128xf32>
    %111 = arith.divf %109, %110 : vector<1x128xf32>
    %112 = vector.extract_strided_slice %111 {offsets = [0, 0], sizes = [1, 32], strides = [1, 1]} : vector<1x128xf32> to vector<1x32xf32>
    %113 = vector.extract_strided_slice %111 {offsets = [0, 32], sizes = [1, 32], strides = [1, 1]} : vector<1x128xf32> to vector<1x32xf32>
    %114 = vector.extract_strided_slice %111 {offsets = [0, 64], sizes = [1, 32], strides = [1, 1]} : vector<1x128xf32> to vector<1x32xf32>
    %cst_24 = arith.constant 2.000000e+00 : f32
    %115 = vector.broadcast %cst_24 : f32 to vector<1x32xf32>
    %116 = arith.mulf %115, %114 : vector<1x32xf32>
    %cst_25 = arith.constant 1.000000e+00 : f32
    %117 = vector.broadcast %cst_25 : f32 to vector<1x32xf32>
    %118 = arith.subf %116, %117 : vector<1x32xf32>
    %119 = vector.extract_strided_slice %111 {offsets = [0, 96], sizes = [1, 32], strides = [1, 1]} : vector<1x128xf32> to vector<1x32xf32>
    %120 = arith.mulf %113, %94 : vector<1x32xf32>
    %121 = arith.mulf %112, %118 : vector<1x32xf32>
    %122 = arith.addf %120, %121 : vector<1x32xf32>
    %123 = math.tanh %122 : vector<1x32xf32>
    %124 = arith.mulf %119, %123 : vector<1x32xf32>
    %125 = vector.broadcast %124 : vector<1x32xf32> to vector<32x32xf32>
    %126 = arith.mulf %7, %125 : vector<32x32xf32>
    %cst_26 = arith.constant dense<0.000000e+00> : vector<32xf32>
    %127 = vector.multi_reduction <add>, %126, %cst_26 [1] : vector<32x32xf32> to vector<32xf32>
    %128 = vector.shape_cast %127 : vector<32xf32> to vector<32x1xf32>
    %129 = vector.broadcast %128 : vector<32x1xf32> to vector<32x128xf32>
    %130 = arith.mulf %129, %0 : vector<32x128xf32>
    %cst_27 = arith.constant dense<0.000000e+00> : vector<128xf32>
    %131 = vector.multi_reduction <add>, %130, %cst_27 [0] : vector<32x128xf32> to vector<128xf32>
    %132 = vector.shape_cast %131 : vector<128xf32> to vector<1x128xf32>
    %133 = vector.extract_strided_slice %10 {offsets = [4, 0], sizes = [1, 128], strides = [1, 1]} : vector<8x128xf32> to vector<1x128xf32>
    %134 = arith.addf %133, %132 : vector<1x128xf32>
    %135 = arith.negf %134 : vector<1x128xf32>
    %136 = math.exp %135 : vector<1x128xf32>
    %cst_28 = arith.constant 1.000000e+00 : f32
    %137 = vector.broadcast %cst_28 : f32 to vector<1x128xf32>
    %138 = arith.addf %137, %136 : vector<1x128xf32>
    %139 = arith.divf %137, %138 : vector<1x128xf32>
    %140 = vector.extract_strided_slice %139 {offsets = [0, 0], sizes = [1, 32], strides = [1, 1]} : vector<1x128xf32> to vector<1x32xf32>
    %141 = vector.extract_strided_slice %139 {offsets = [0, 32], sizes = [1, 32], strides = [1, 1]} : vector<1x128xf32> to vector<1x32xf32>
    %142 = vector.extract_strided_slice %139 {offsets = [0, 64], sizes = [1, 32], strides = [1, 1]} : vector<1x128xf32> to vector<1x32xf32>
    %cst_29 = arith.constant 2.000000e+00 : f32
    %143 = vector.broadcast %cst_29 : f32 to vector<1x32xf32>
    %144 = arith.mulf %143, %142 : vector<1x32xf32>
    %cst_30 = arith.constant 1.000000e+00 : f32
    %145 = vector.broadcast %cst_30 : f32 to vector<1x32xf32>
    %146 = arith.subf %144, %145 : vector<1x32xf32>
    %147 = vector.extract_strided_slice %139 {offsets = [0, 96], sizes = [1, 32], strides = [1, 1]} : vector<1x128xf32> to vector<1x32xf32>
    %148 = arith.mulf %141, %122 : vector<1x32xf32>
    %149 = arith.mulf %140, %146 : vector<1x32xf32>
    %150 = arith.addf %148, %149 : vector<1x32xf32>
    %151 = math.tanh %150 : vector<1x32xf32>
    %152 = arith.mulf %147, %151 : vector<1x32xf32>
    %153 = vector.broadcast %152 : vector<1x32xf32> to vector<32x32xf32>
    %154 = arith.mulf %7, %153 : vector<32x32xf32>
    %cst_31 = arith.constant dense<0.000000e+00> : vector<32xf32>
    %155 = vector.multi_reduction <add>, %154, %cst_31 [1] : vector<32x32xf32> to vector<32xf32>
    %156 = vector.shape_cast %155 : vector<32xf32> to vector<32x1xf32>
    %157 = vector.broadcast %156 : vector<32x1xf32> to vector<32x128xf32>
    %158 = arith.mulf %157, %0 : vector<32x128xf32>
    %cst_32 = arith.constant dense<0.000000e+00> : vector<128xf32>
    %159 = vector.multi_reduction <add>, %158, %cst_32 [0] : vector<32x128xf32> to vector<128xf32>
    %160 = vector.shape_cast %159 : vector<128xf32> to vector<1x128xf32>
    %161 = vector.extract_strided_slice %10 {offsets = [5, 0], sizes = [1, 128], strides = [1, 1]} : vector<8x128xf32> to vector<1x128xf32>
    %162 = arith.addf %161, %160 : vector<1x128xf32>
    %163 = arith.negf %162 : vector<1x128xf32>
    %164 = math.exp %163 : vector<1x128xf32>
    %cst_33 = arith.constant 1.000000e+00 : f32
    %165 = vector.broadcast %cst_33 : f32 to vector<1x128xf32>
    %166 = arith.addf %165, %164 : vector<1x128xf32>
    %167 = arith.divf %165, %166 : vector<1x128xf32>
    %168 = vector.extract_strided_slice %167 {offsets = [0, 0], sizes = [1, 32], strides = [1, 1]} : vector<1x128xf32> to vector<1x32xf32>
    %169 = vector.extract_strided_slice %167 {offsets = [0, 32], sizes = [1, 32], strides = [1, 1]} : vector<1x128xf32> to vector<1x32xf32>
    %170 = vector.extract_strided_slice %167 {offsets = [0, 64], sizes = [1, 32], strides = [1, 1]} : vector<1x128xf32> to vector<1x32xf32>
    %cst_34 = arith.constant 2.000000e+00 : f32
    %171 = vector.broadcast %cst_34 : f32 to vector<1x32xf32>
    %172 = arith.mulf %171, %170 : vector<1x32xf32>
    %cst_35 = arith.constant 1.000000e+00 : f32
    %173 = vector.broadcast %cst_35 : f32 to vector<1x32xf32>
    %174 = arith.subf %172, %173 : vector<1x32xf32>
    %175 = vector.extract_strided_slice %167 {offsets = [0, 96], sizes = [1, 32], strides = [1, 1]} : vector<1x128xf32> to vector<1x32xf32>
    %176 = arith.mulf %169, %150 : vector<1x32xf32>
    %177 = arith.mulf %168, %174 : vector<1x32xf32>
    %178 = arith.addf %176, %177 : vector<1x32xf32>
    %179 = math.tanh %178 : vector<1x32xf32>
    %180 = arith.mulf %175, %179 : vector<1x32xf32>
    %181 = vector.broadcast %180 : vector<1x32xf32> to vector<32x32xf32>
    %182 = arith.mulf %7, %181 : vector<32x32xf32>
    %cst_36 = arith.constant dense<0.000000e+00> : vector<32xf32>
    %183 = vector.multi_reduction <add>, %182, %cst_36 [1] : vector<32x32xf32> to vector<32xf32>
    %184 = vector.shape_cast %183 : vector<32xf32> to vector<32x1xf32>
    %185 = vector.broadcast %184 : vector<32x1xf32> to vector<32x128xf32>
    %186 = arith.mulf %185, %0 : vector<32x128xf32>
    %cst_37 = arith.constant dense<0.000000e+00> : vector<128xf32>
    %187 = vector.multi_reduction <add>, %186, %cst_37 [0] : vector<32x128xf32> to vector<128xf32>
    %188 = vector.shape_cast %187 : vector<128xf32> to vector<1x128xf32>
    %189 = vector.extract_strided_slice %10 {offsets = [6, 0], sizes = [1, 128], strides = [1, 1]} : vector<8x128xf32> to vector<1x128xf32>
    %190 = arith.addf %189, %188 : vector<1x128xf32>
    %191 = arith.negf %190 : vector<1x128xf32>
    %192 = math.exp %191 : vector<1x128xf32>
    %cst_38 = arith.constant 1.000000e+00 : f32
    %193 = vector.broadcast %cst_38 : f32 to vector<1x128xf32>
    %194 = arith.addf %193, %192 : vector<1x128xf32>
    %195 = arith.divf %193, %194 : vector<1x128xf32>
    %196 = vector.extract_strided_slice %195 {offsets = [0, 0], sizes = [1, 32], strides = [1, 1]} : vector<1x128xf32> to vector<1x32xf32>
    %197 = vector.extract_strided_slice %195 {offsets = [0, 32], sizes = [1, 32], strides = [1, 1]} : vector<1x128xf32> to vector<1x32xf32>
    %198 = vector.extract_strided_slice %195 {offsets = [0, 64], sizes = [1, 32], strides = [1, 1]} : vector<1x128xf32> to vector<1x32xf32>
    %cst_39 = arith.constant 2.000000e+00 : f32
    %199 = vector.broadcast %cst_39 : f32 to vector<1x32xf32>
    %200 = arith.mulf %199, %198 : vector<1x32xf32>
    %cst_40 = arith.constant 1.000000e+00 : f32
    %201 = vector.broadcast %cst_40 : f32 to vector<1x32xf32>
    %202 = arith.subf %200, %201 : vector<1x32xf32>
    %203 = vector.extract_strided_slice %195 {offsets = [0, 96], sizes = [1, 32], strides = [1, 1]} : vector<1x128xf32> to vector<1x32xf32>
    %204 = arith.mulf %197, %178 : vector<1x32xf32>
    %205 = arith.mulf %196, %202 : vector<1x32xf32>
    %206 = arith.addf %204, %205 : vector<1x32xf32>
    %207 = math.tanh %206 : vector<1x32xf32>
    %208 = arith.mulf %203, %207 : vector<1x32xf32>
    %209 = vector.broadcast %208 : vector<1x32xf32> to vector<32x32xf32>
    %210 = arith.mulf %7, %209 : vector<32x32xf32>
    %cst_41 = arith.constant dense<0.000000e+00> : vector<32xf32>
    %211 = vector.multi_reduction <add>, %210, %cst_41 [1] : vector<32x32xf32> to vector<32xf32>
    %212 = vector.shape_cast %211 : vector<32xf32> to vector<32x1xf32>
    %213 = vector.broadcast %212 : vector<32x1xf32> to vector<32x128xf32>
    %214 = arith.mulf %213, %0 : vector<32x128xf32>
    %cst_42 = arith.constant dense<0.000000e+00> : vector<128xf32>
    %215 = vector.multi_reduction <add>, %214, %cst_42 [0] : vector<32x128xf32> to vector<128xf32>
    %216 = vector.shape_cast %215 : vector<128xf32> to vector<1x128xf32>
    %217 = vector.extract_strided_slice %10 {offsets = [7, 0], sizes = [1, 128], strides = [1, 1]} : vector<8x128xf32> to vector<1x128xf32>
    %218 = arith.addf %217, %216 : vector<1x128xf32>
    %219 = arith.negf %218 : vector<1x128xf32>
    %220 = math.exp %219 : vector<1x128xf32>
    %cst_43 = arith.constant 1.000000e+00 : f32
    %221 = vector.broadcast %cst_43 : f32 to vector<1x128xf32>
    %222 = arith.addf %221, %220 : vector<1x128xf32>
    %223 = arith.divf %221, %222 : vector<1x128xf32>
    %224 = vector.extract_strided_slice %223 {offsets = [0, 0], sizes = [1, 32], strides = [1, 1]} : vector<1x128xf32> to vector<1x32xf32>
    %225 = vector.extract_strided_slice %223 {offsets = [0, 32], sizes = [1, 32], strides = [1, 1]} : vector<1x128xf32> to vector<1x32xf32>
    %226 = vector.extract_strided_slice %223 {offsets = [0, 64], sizes = [1, 32], strides = [1, 1]} : vector<1x128xf32> to vector<1x32xf32>
    %cst_44 = arith.constant 2.000000e+00 : f32
    %227 = vector.broadcast %cst_44 : f32 to vector<1x32xf32>
    %228 = arith.mulf %227, %226 : vector<1x32xf32>
    %cst_45 = arith.constant 1.000000e+00 : f32
    %229 = vector.broadcast %cst_45 : f32 to vector<1x32xf32>
    %230 = arith.subf %228, %229 : vector<1x32xf32>
    %231 = vector.extract_strided_slice %223 {offsets = [0, 96], sizes = [1, 32], strides = [1, 1]} : vector<1x128xf32> to vector<1x32xf32>
    %232 = arith.mulf %225, %206 : vector<1x32xf32>
    %233 = arith.mulf %224, %230 : vector<1x32xf32>
    %234 = arith.addf %232, %233 : vector<1x32xf32>
    %235 = math.tanh %234 : vector<1x32xf32>
    %236 = arith.mulf %231, %235 : vector<1x32xf32>
    %237 = tpu.concatenate %40, %68, %96, %124, %152, %180, %208, %236 in 0 : vector<1x32xf32>, vector<1x32xf32>, vector<1x32xf32>, vector<1x32xf32>, vector<1x32xf32>, vector<1x32xf32>, vector<1x32xf32>, vector<1x32xf32> -> vector<8x32xf32>
    %c40 = arith.constant 40 : index
    %c0_46 = arith.constant 0 : index
    %238 = vector.load %arg1[%c40, %c0_46] : memref<49x128xf32, #tpu.memory_space<vmem>>, vector<8x32xf32>
    %239 = arith.mulf %237, %238 : vector<8x32xf32>
    %cst_47 = arith.constant dense<0.000000e+00> : vector<32xf32>
    %240 = vector.multi_reduction <add>, %239, %cst_47 [0] : vector<8x32xf32> to vector<32xf32>
    %241 = vector.shape_cast %240 : vector<32xf32> to vector<1x32xf32>
    %cst_48 = arith.constant dense<0.000000e+00> : vector<1xf32>
    %242 = vector.multi_reduction <add>, %241, %cst_48 [1] : vector<1x32xf32> to vector<1xf32>
    %243 = vector.shape_cast %242 : vector<1xf32> to vector<1x1xf32>
    %c48 = arith.constant 48 : index
    %c0_49 = arith.constant 0 : index
    %244 = vector.load %arg1[%c48, %c0_49] : memref<49x128xf32, #tpu.memory_space<vmem>>, vector<1x1xf32>
    %245 = arith.addf %243, %244 : vector<1x1xf32>
    %c0_50 = arith.constant 0 : index
    %c0_51 = arith.constant 0 : index
    %246 = vector.load %arg2[%c0_50, %c0_51] : memref<1x1xf32, #tpu.memory_space<vmem>>, vector<1x1xf32>
    tpu.vector_store %arg2[%c0_50, %c0_51], %245 {strides = array<i32>} : memref<1x1xf32, #tpu.memory_space<vmem>>, vector<1x1xf32>,
    return
  }
}

</mosaic_0001>

<bundles_post_ra>
// kernel: tpu_custom_call.1
= control target key start
LH: loop header
LB: loop body
LE: loop exit
PB: predicated region body
PF: predicated region fallthrough
CT: control target
= control target key end

     0   :  { %7 = vsyncpa [#allocation3], 0  ;;  %s1069_s0 = inlined_call_operand.hbm [shape: f32[8,8], index: 0, kind: input, shape index: {}]   ;;  %s1070_s1 = inlined_call_operand.hbm [shape: f32[49,128], index: 1, kind: input, shape index: {}]   ;;  %s1071_s2 = inlined_call_operand.hbm [shape: f32[1,1], index: 2, kind: output, shape index: {}]  }
   0x1   :  { %8 = vsyncpa [#allocation6], 0 }
   0x2   :  { %9 = vsyncpa [#allocation4], 0  ;;  %s862_s9 = smov [#allocation2]   ;;  %s863_s11 = smov [#allocation5]  }
   0x3   :  { %s16_s10 = sshll.u32 %s862_s9, 4  ;;  %s25_s12 = sshll.u32 %s863_s11, 4  ;;  %s17_s10 = int_to_ptr.vmem [resolvable:$true] %s16_s10  ;;  %s26_s12 = int_to_ptr.vmem [resolvable:$true] %s25_s12 }
   0x4   :  { %s804_s13 = scalar_lea.vmem %s17_s10, 128  ;;  %p809_p1 = scmp.lt.s32.totalorder %s17_s10, %s17_s10 }
   0x5   :  { %p805_p0 = scmp.ne.s32.totalorder %s17_s10, %s804_s13  ;;  %p810_p2 = scmp.lt.s32.totalorder %s804_s13, %s804_s13 }
   0x7   :  { %p811_p3 = por %p810_p2, %p809_p1 }
   0x9   :  { %p812_p4 = pnand %p811_p3, %p805_p0 }
   0xb   :  { %815 = shalt.err (!%p812_p4)
}
   0xc   :  { %19 = dma.hbm_to_vmem [thread:$0]  %s1069_s0, 128, %s17_s10, [#allocation3]  }
   0xd   :  { %s824_s16 = scalar_lea.vmem %s26_s12, 896  ;;  %p829_p6 = scmp.lt.s32.totalorder %s26_s12, %s26_s12 }
   0xe   :  { %p825_p5 = scmp.ne.s32.totalorder %s26_s12, %s824_s16  ;;  %p830_p7 = scmp.lt.s32.totalorder %s824_s16, %s824_s16 }
  0x10   :  { %p831_p8 = por %p830_p7, %p829_p6 }
  0x12   :  { %p832_p9 = pnand %p831_p8, %p825_p5 }
  0x14   :  { %835 = shalt.err (!%p832_p9)
}
  0x15   :  { %s864_s17 = smov 128   ;;  %s865_s18 = smov 8  }
  0x16   :  { %31 = dma.hbm_to_vmem [thread:$0]  %s1070_s1, 896, %s26_s12, [#allocation6], %s864_s17, %s864_s17, %s865_s18  }
  0x17   :  { %856 = dma.done.wait [#allocation3], 128  }
  0x18   :  { %857 = vsyncadd [#allocation3], 4294967168 }
  0x19   :  { %858 = dma.done.wait [#allocation6], 896  }
  0x1a   :  { %859 = vsyncadd [#allocation6], 4294966400  ;;  %v42_v0 = vlaneseq  ;;  %v866_v1 = vmov 0.0   ;;  %vm867_vm0 = vmmov 0   ;;  %vm63_vm2 = vcmask 64512   ;;  %v62_v12 = vld [vmem:[#allocation5] sm:$0xff] }
  0x1b   :  { %733 = vmatprep.subr.mxu0 %v866_v1  ;;  %735 = vmatprep.mubr.msk.f32.mxu0 %vm867_vm0, %v866_v1  ;;  %vm141_vm3 = vcmask 261120   ;;  %v61_v13 = vld [vmem:[#allocation2] sm:$0xff]  ;;  %v916_v22 = vld [vmem:[#allocation5 + $0x8] sm:$0xff]  ;;  %v918_v24 = vld [vmem:[#allocation5 + $0x10] sm:$0xff]  ;;  %s868_s0 = smov 64   ;;  %s869_s1 = smov 32  }
  0x1c   :  { %v893_v2 = vshrl.u32 %v42_v0, 7  ;;  %v48_v3 = vand.u32 127, %v42_v0  ;;  %734 = vmatpush3.msra.mxu0 %v62_v12  ;;  %v922_v28 = vld [vmem:[#allocation5 + $0x18] sm:$0xff]  ;;  %v925_v32 = vld [vmem:[#allocation5 + $0x20] sm:$0xff]  ;;  %vm655_vm7 = vcmask 1040384   ;;  %vm657_vm8 = vcmask 1041408  }
  0x1d   :  { %736 = vmatmul.mubr.msk.f32.vlgmr.msra.gmra.mxu0 %vm63_vm2, %v61_v13  ;;  %vm659_vm9 = vcmask 1042432   ;;  %vm661_vm10 = vcmask 1043456   ;;  %vm663_vm11 = vcmask 1044480   ;;  %vm665_vm12 = vcmask 1045504   ;;  %s870_s21 = smov 96   ;;  %s871_s22 = smov [#allocation7]  }
  0x1e   :  { %v44_v4 = vadd.s32 8, %v893_v2  ;;  %v45_v5 = vadd.s32 16, %v893_v2  ;;  %v46_v6 = vadd.s32 24, %v893_v2  ;;  %vm49_vm1 = vcmp.eq.s32.totalorder %v893_v2, %v48_v3  ;;  %s700_s23 = sshll.u32 %s871_s22, 4  ;;  %s701_s23 = int_to_ptr.vmem [resolvable:$true] %s700_s23 }
  0x1f   :  { %v899_v7 = vsel %vm49_vm1, 1.0, %v866_v1  ;;  %v195_v57 = vsub.s32 0, %v893_v2  ;;  %vm667_vm13 = vcmask 1046528   ;;  %vm675_vm14 = vcmask 1048320   ;;  %s836_s24 = scalar_lea.vmem %s701_s23, 16  ;;  %s840_s25 = scalar_lea.vmem %s701_s23, 32 }
  0x20   :  { %vm50_vm4 = vcmp.eq.s32.totalorder %v44_v4, %v48_v3  ;;  %vm51_vm5 = vcmp.eq.s32.totalorder %v45_v5, %v48_v3  ;;  %vm52_vm6 = vcmp.eq.s32.totalorder %v46_v6, %v48_v3  ;;  %v137_v8 = vmul.f32 0.0, %v899_v7  ;;  %p837_p10 = scmp.ne.s32.totalorder %s701_s23, %s836_s24  ;;  %p841_p11 = scmp.lt.s32.totalorder %s701_s23, %s701_s23 }
  0x21   :  { %v902_v9 = vsel %vm50_vm4, 1.0, %v866_v1  ;;  %v904_v10 = vsel %vm51_vm5, 1.0, %v866_v1  ;;  %v906_v11 = vsel %vm52_vm6, 1.0, %v866_v1  ;;  %vm692_vm15 = vcmask 0   ;;  %p842_p12 = scmp.lt.s32.totalorder %s840_s25, %s836_s24 }
  0x22   :  { %v142_v14 = vsel %vm141_vm3, %v137_v8, 0.0  ;;  %v139_v15 = vmul.f32 0.0, %v904_v10  ;;  %v138_v16 = vmul.f32 0.0, %v902_v9  ;;  %v140_v17 = vmul.f32 0.0, %v906_v11 }
  0x23   :  { %143 = vadd.xlane.f32.xlu0 %v142_v14  ;;  %p843_p13 = por %p842_p12, %p841_p11 }
  0x24   :  { %v148_v18 = vsel %vm141_vm3, %v139_v15, 0.0  ;;  %v145_v19 = vsel %vm141_vm3, %v138_v16, 0.0  ;;  %v151_v20 = vsel %vm141_vm3, %v140_v17, 0.0 }
  0x25   :  { %149 = vadd.xlane.f32.xlu1 %v148_v18  ;;  %p844_p0 = pnand %p843_p13, %p837_p10 }
  0x27   :  { %146 = vadd.xlane.f32.xlu0 %v145_v19 }
  0x29   :  { %152 = vadd.xlane.f32.xlu1 %v151_v20 }
  0xac   :  { %v144_v21 = vpop.xlane.xlu0 %143 }
  0xad   :  { %v154_v26 = vmul.f32 %v144_v21, %v916_v22 }
  0xae   :  { %v150_v25 = vpop.xlane.xlu1 %149 }
  0xaf   :  { %v156_v29 = vmul.f32 %v150_v25, %v922_v28 }
  0xb0   :  { %v147_v23 = vpop.xlane.xlu0 %146 }
  0xb1   :  { %v155_v27 = vmul.f32 %v147_v23, %v918_v24 }
  0xb2   :  { %v153_v31 = vpop.xlane.xlu1 %152 }
  0xb3   :  { %v158_v30 = vadd.f32 %v155_v27, %v154_v26  ;;  %v157_v33 = vmul.f32 %v153_v31, %v925_v32 }
  0xb5   :  { %v159_v34 = vadd.f32 %v158_v30, %v156_v29 }
  0xb7   :  { %v160_v35 = vadd.f32 %v159_v34, %v157_v33 }
  0xb9   :  { %v161_v36 = vrot.slane %v160_v35, 4 }
  0xbb   :  { %v162_v37 = vadd.f32 %v161_v36, %v160_v35 }
  0xbd   :  { %v163_v38 = vrot.slane %v162_v37, 2 }
  0xbf   :  { %v164_v39 = vadd.f32 %v163_v38, %v162_v37 }
  0xc1   :  { %v165_v40 = vrot.slane %v164_v39, 1 }
  0xc3   :  { %v166_v41 = vadd.f32 %v165_v40, %v164_v39 }
  0xdd   :  { %v928_v42 = vpop.f32.mrf.mxu0 }
  0xde   :  { %v167_v43 = vadd.f32 %v166_v41, %v928_v42 }
  0xdf   :  { %v737_v44 = vpop.f32.mrf.mxu0 }
  0xe0   :  { %v715_v45 = vmul.f32 -1.442695, %v167_v43 }
  0xe2   :  { %748 = vpow2.f32 %v715_v45 }
  0xef   :  { %v749_v46 = vpop.eup %748 }
  0xf0   :  { %v171_v47 = vadd.f32 1.0, %v749_v46 }
  0xf2   :  { %750 = vrcp.f32 %v171_v47  ;;  %v261_v47 = vsub.s32 1, %v893_v2 }
  0xff   :  { %v751_v48 = vpop.eup %750 }
 0x100   :  { %v174_v49 = vmul.f32 2.0, %v751_v48  ;;  %v176_v53 = vmul.f32 0.0, %v751_v48 }
 0x102   :  { %v716_v50 = vadd.f32 -1.0, %v174_v49 }
 0x104   :  { %178 = vrot.lane.b32.xlu0 %v716_v50, %s868_s0 }
 0x176   :  { %v179_v51 = vpop.permute.xlu0 %178 }
 0x177   :  { %v181_v52 = vmul.f32 %v751_v48, %v179_v51 }
 0x179   :  { %183 = vrot.lane.b32.xlu1 %v181_v52, %s869_s1 }
 0x1eb   :  { %v184_v54 = vpop.permute.xlu1 %183 }
 0x1ec   :  { %v186_v55 = vadd.f32 %v184_v54, %v176_v53 }
 0x1ee   :  { %752 = vtanh.f32 %v186_v55  ;;  %v240_v41 = vrot.slane %v186_v55, 7 }
 0x1fb   :  { %v753_v56 = vpop.eup %752 }
 0x1fc   :  { %189 = vrot.lane.b32.xlu1 %v753_v56, %s868_s0 }
 0x26e   :  { %v190_v58 = vpop.permute.xlu1 %189 }
 0x26f   :  { %v935_v59 = vmul.f32 %v751_v48, %v190_v58 }
 0x271   :  { %v196_v60 = vrot.slane %v935_v59, %v195_v57 }
 0x273   :  { %198 = vrot.lane.b32.xlu1 %v196_v60, %s869_s1 }
 0x2e5   :  { %v199_v61 = vpop.permute.xlu1 %198 }
 0x2e6   :  { %v202_v62 = vmul.f32 %v902_v9, %v199_v61  ;;  %v201_v63 = vmul.f32 %v899_v7, %v199_v61  ;;  %v203_v3 = vmul.f32 %v904_v10, %v199_v61  ;;  %v204_v5 = vmul.f32 %v906_v11, %v199_v61 }
 0x2e8   :  { %v208_v0 = vsel %vm141_vm3, %v202_v62, 0.0  ;;  %v205_v1 = vsel %vm141_vm3, %v201_v63, 0.0  ;;  %v211_v4 = vsel %vm141_vm3, %v203_v3, 0.0  ;;  %v214_v6 = vsel %vm141_vm3, %v204_v5, 0.0 }
 0x2e9   :  { %209 = vadd.xlane.f32.xlu1 %v208_v0  ;;  %206 = vadd.xlane.f32.xlu0 %v205_v1 }
 0x2ed   :  { %212 = vadd.xlane.f32.xlu0 %v211_v4 }
 0x2f1   :  { %215 = vadd.xlane.f32.xlu0 %v214_v6 }
 0x372   :  { %v210_v8 = vpop.xlane.xlu1 %209  ;;  %v207_v12 = vpop.xlane.xlu0 %206 }
 0x373   :  { %v218_v13 = vmul.f32 %v210_v8, %v918_v24  ;;  %v217_v14 = vmul.f32 %v207_v12, %v916_v22 }
 0x375   :  { %v221_v17 = vadd.f32 %v218_v13, %v217_v14 }
 0x376   :  { %v213_v15 = vpop.xlane.xlu0 %212 }
 0x377   :  { %v219_v16 = vmul.f32 %v213_v15, %v922_v28 }
 0x379   :  { %v222_v19 = vadd.f32 %v221_v17, %v219_v16 }
 0x37a   :  { %v216_v18 = vpop.xlane.xlu0 %215 }
 0x37b   :  { %v220_v20 = vmul.f32 %v216_v18, %v925_v32 }
 0x37d   :  { %v223_v21 = vadd.f32 %v222_v19, %v220_v20 }
 0x37f   :  { %v224_v23 = vrot.slane %v223_v21, 4 }
 0x381   :  { %v225_v25 = vadd.f32 %v224_v23, %v223_v21 }
 0x383   :  { %v226_v26 = vrot.slane %v225_v25, 2 }
 0x385   :  { %v227_v27 = vadd.f32 %v226_v26, %v225_v25 }
 0x387   :  { %v228_v29 = vrot.slane %v227_v27, 1 }
 0x389   :  { %v229_v30 = vadd.f32 %v228_v29, %v227_v27 }
 0x38b   :  { %v230_v31 = vadd.f32 %v229_v30, %v928_v42 }
 0x38d   :  { %v717_v33 = vmul.f32 -1.442695, %v230_v31 }
 0x38f   :  { %754 = vpow2.f32 %v717_v33 }
 0x39c   :  { %v755_v34 = vpop.eup %754 }
 0x39d   :  { %v234_v35 = vadd.f32 1.0, %v755_v34 }
 0x39f   :  { %756 = vrcp.f32 %v234_v35 }
 0x3ac   :  { %v757_v36 = vpop.eup %756 }
 0x3ad   :  { %v237_v37 = vmul.f32 2.0, %v757_v36  ;;  %v242_v43 = vmul.f32 %v757_v36, %v240_v41 }
 0x3af   :  { %v718_v38 = vadd.f32 -1.0, %v237_v37  ;;  %v327_v37 = vsub.s32 2, %v893_v2 }
 0x3b1   :  { %244 = vrot.lane.b32.xlu0 %v718_v38, %s868_s0 }
 0x423   :  { %v245_v39 = vpop.permute.xlu0 %244 }
 0x424   :  { %v247_v40 = vmul.f32 %v757_v36, %v245_v39 }
 0x426   :  { %249 = vrot.lane.b32.xlu1 %v247_v40, %s869_s1 }
 0x498   :  { %v250_v44 = vpop.permute.xlu1 %249 }
 0x499   :  { %v252_v45 = vadd.f32 %v250_v44, %v242_v43 }
 0x49b   :  { %758 = vtanh.f32 %v252_v45  ;;  %v306_v31 = vrot.slane %v252_v45, 7 }
 0x4a8   :  { %v759_v46 = vpop.eup %758 }
 0x4a9   :  { %255 = vrot.lane.b32.xlu1 %v759_v46, %s868_s0 }
 0x51b   :  { %v256_v48 = vpop.permute.xlu1 %255 }
 0x51c   :  { %v258_v49 = vmul.f32 %v757_v36, %v256_v48 }
 0x51e   :  { %v262_v50 = vrot.slane %v258_v49, %v261_v47  ;;  %v656_v40 = vsel %vm655_vm7, %v935_v59, %v258_v49 }
 0x520   :  { %264 = vrot.lane.b32.xlu1 %v262_v50, %s869_s1 }
 0x592   :  { %v265_v51 = vpop.permute.xlu1 %264 }
 0x593   :  { %v268_v52 = vmul.f32 %v902_v9, %v265_v51  ;;  %v267_v53 = vmul.f32 %v899_v7, %v265_v51  ;;  %v269_v56 = vmul.f32 %v904_v10, %v265_v51  ;;  %v270_v58 = vmul.f32 %v906_v11, %v265_v51 }
 0x595   :  { %v274_v54 = vsel %vm141_vm3, %v268_v52, 0.0  ;;  %v271_v55 = vsel %vm141_vm3, %v267_v53, 0.0  ;;  %v277_v57 = vsel %vm141_vm3, %v269_v56, 0.0  ;;  %v280_v60 = vsel %vm141_vm3, %v270_v58, 0.0 }
 0x596   :  { %275 = vadd.xlane.f32.xlu1 %v274_v54  ;;  %272 = vadd.xlane.f32.xlu0 %v271_v55 }
 0x59a   :  { %278 = vadd.xlane.f32.xlu0 %v277_v57 }
 0x59e   :  { %281 = vadd.xlane.f32.xlu0 %v280_v60 }
 0x61f   :  { %v276_v61 = vpop.xlane.xlu1 %275  ;;  %v273_v62 = vpop.xlane.xlu0 %272 }
 0x620   :  { %v284_v63 = vmul.f32 %v276_v61, %v918_v24  ;;  %v283_v0 = vmul.f32 %v273_v62, %v916_v22 }
 0x622   :  { %v287_v4 = vadd.f32 %v284_v63, %v283_v0 }
 0x623   :  { %v279_v1 = vpop.xlane.xlu0 %278 }
 0x624   :  { %v285_v3 = vmul.f32 %v279_v1, %v922_v28 }
 0x626   :  { %v288_v6 = vadd.f32 %v287_v4, %v285_v3 }
 0x627   :  { %v282_v5 = vpop.xlane.xlu0 %281 }
 0x628   :  { %v286_v8 = vmul.f32 %v282_v5, %v925_v32 }
 0x62a   :  { %v289_v12 = vadd.f32 %v288_v6, %v286_v8 }
 0x62c   :  { %v290_v13 = vrot.slane %v289_v12, 4 }
 0x62e   :  { %v291_v14 = vadd.f32 %v290_v13, %v289_v12 }
 0x630   :  { %v292_v15 = vrot.slane %v291_v14, 2 }
 0x632   :  { %v293_v16 = vadd.f32 %v292_v15, %v291_v14 }
 0x634   :  { %v294_v17 = vrot.slane %v293_v16, 1 }
 0x636   :  { %v295_v18 = vadd.f32 %v294_v17, %v293_v16 }
 0x638   :  { %v296_v19 = vadd.f32 %v295_v18, %v928_v42 }
 0x63a   :  { %v719_v20 = vmul.f32 -1.442695, %v296_v19 }
 0x63c   :  { %760 = vpow2.f32 %v719_v20 }
 0x649   :  { %v761_v21 = vpop.eup %760 }
 0x64a   :  { %v300_v23 = vadd.f32 1.0, %v761_v21 }
 0x64c   :  { %762 = vrcp.f32 %v300_v23 }
 0x659   :  { %v763_v25 = vpop.eup %762 }
 0x65a   :  { %v303_v26 = vmul.f32 2.0, %v763_v25  ;;  %v308_v33 = vmul.f32 %v763_v25, %v306_v31 }
 0x65c   :  { %v720_v27 = vadd.f32 -1.0, %v303_v26 }
 0x65e   :  { %310 = vrot.lane.b32.xlu0 %v720_v27, %s868_s0  ;;  %v393_v27 = vsub.s32 3, %v893_v2 }
 0x6d0   :  { %v311_v29 = vpop.permute.xlu0 %310 }
 0x6d1   :  { %v313_v30 = vmul.f32 %v763_v25, %v311_v29 }
 0x6d3   :  { %315 = vrot.lane.b32.xlu1 %v313_v30, %s869_s1 }
 0x745   :  { %v316_v34 = vpop.permute.xlu1 %315 }
 0x746   :  { %v318_v35 = vadd.f32 %v316_v34, %v308_v33 }
 0x748   :  { %764 = vtanh.f32 %v318_v35  ;;  %v372_v20 = vrot.slane %v318_v35, 7 }
 0x755   :  { %v765_v36 = vpop.eup %764 }
 0x756   :  { %321 = vrot.lane.b32.xlu1 %v765_v36, %s868_s0 }
 0x7c8   :  { %v322_v38 = vpop.permute.xlu1 %321 }
 0x7c9   :  { %v324_v39 = vmul.f32 %v763_v25, %v322_v38 }
 0x7cb   :  { %v328_v41 = vrot.slane %v324_v39, %v327_v37  ;;  %v658_v43 = vsel %vm657_vm8, %v656_v40, %v324_v39 }
 0x7cd   :  { %330 = vrot.lane.b32.xlu1 %v328_v41, %s869_s1 }
 0x83f   :  { %v331_v44 = vpop.permute.xlu1 %330 }
 0x840   :  { %v334_v45 = vmul.f32 %v902_v9, %v331_v44  ;;  %v333_v46 = vmul.f32 %v899_v7, %v331_v44  ;;  %v335_v50 = vmul.f32 %v904_v10, %v331_v44  ;;  %v336_v59 = vmul.f32 %v906_v11, %v331_v44 }
 0x842   :  { %v340_v47 = vsel %vm141_vm3, %v334_v45, 0.0  ;;  %v337_v48 = vsel %vm141_vm3, %v333_v46, 0.0  ;;  %v343_v51 = vsel %vm141_vm3, %v335_v50, 0.0  ;;  %v346_v49 = vsel %vm141_vm3, %v336_v59, 0.0 }
 0x843   :  { %341 = vadd.xlane.f32.xlu1 %v340_v47  ;;  %338 = vadd.xlane.f32.xlu0 %v337_v48 }
 0x847   :  { %344 = vadd.xlane.f32.xlu0 %v343_v51 }
 0x84b   :  { %347 = vadd.xlane.f32.xlu0 %v346_v49 }
 0x8cc   :  { %v342_v52 = vpop.xlane.xlu1 %341  ;;  %v339_v53 = vpop.xlane.xlu0 %338 }
 0x8cd   :  { %v350_v54 = vmul.f32 %v342_v52, %v918_v24  ;;  %v349_v55 = vmul.f32 %v339_v53, %v916_v22 }
 0x8cf   :  { %v353_v58 = vadd.f32 %v350_v54, %v349_v55 }
 0x8d0   :  { %v345_v56 = vpop.xlane.xlu0 %344 }
 0x8d1   :  { %v351_v57 = vmul.f32 %v345_v56, %v922_v28 }
 0x8d3   :  { %v354_v61 = vadd.f32 %v353_v58, %v351_v57 }
 0x8d4   :  { %v348_v60 = vpop.xlane.xlu0 %347 }
 0x8d5   :  { %v352_v62 = vmul.f32 %v348_v60, %v925_v32 }
 0x8d7   :  { %v355_v63 = vadd.f32 %v354_v61, %v352_v62 }
 0x8d9   :  { %v356_v0 = vrot.slane %v355_v63, 4 }
 0x8db   :  { %v357_v1 = vadd.f32 %v356_v0, %v355_v63 }
 0x8dd   :  { %v358_v3 = vrot.slane %v357_v1, 2 }
 0x8df   :  { %v359_v4 = vadd.f32 %v358_v3, %v357_v1 }
 0x8e1   :  { %v360_v5 = vrot.slane %v359_v4, 1 }
 0x8e3   :  { %v361_v6 = vadd.f32 %v360_v5, %v359_v4 }
 0x8e5   :  { %v362_v8 = vadd.f32 %v361_v6, %v928_v42 }
 0x8e7   :  { %v721_v12 = vmul.f32 -1.442695, %v362_v8 }
 0x8e9   :  { %766 = vpow2.f32 %v721_v12 }
 0x8f6   :  { %v767_v13 = vpop.eup %766 }
 0x8f7   :  { %v366_v14 = vadd.f32 1.0, %v767_v13 }
 0x8f9   :  { %768 = vrcp.f32 %v366_v14 }
 0x906   :  { %v769_v15 = vpop.eup %768 }
 0x907   :  { %v369_v16 = vmul.f32 2.0, %v769_v15  ;;  %v374_v21 = vmul.f32 %v769_v15, %v372_v20 }
 0x909   :  { %v722_v17 = vadd.f32 -1.0, %v369_v16  ;;  %v459_v16 = vsub.s32 4, %v893_v2 }
 0x90b   :  { %376 = vrot.lane.b32.xlu0 %v722_v17, %s868_s0 }
 0x97d   :  { %v377_v18 = vpop.permute.xlu0 %376 }
 0x97e   :  { %v379_v19 = vmul.f32 %v769_v15, %v377_v18 }
 0x980   :  { %381 = vrot.lane.b32.xlu1 %v379_v19, %s869_s1 }
 0x9f2   :  { %v382_v23 = vpop.permute.xlu1 %381 }
 0x9f3   :  { %v384_v25 = vadd.f32 %v382_v23, %v374_v21 }
 0x9f5   :  { %770 = vtanh.f32 %v384_v25  ;;  %v438_v8 = vrot.slane %v384_v25, 7 }
 0xa02   :  { %v771_v26 = vpop.eup %770 }
 0xa03   :  { %387 = vrot.lane.b32.xlu1 %v771_v26, %s868_s0 }
 0xa75   :  { %v388_v29 = vpop.permute.xlu1 %387 }
 0xa76   :  { %v390_v30 = vmul.f32 %v769_v15, %v388_v29 }
 0xa78   :  { %v394_v31 = vrot.slane %v390_v30, %v393_v27  ;;  %v660_v33 = vsel %vm659_vm9, %v658_v43, %v390_v30 }
 0xa7a   :  { %396 = vrot.lane.b32.xlu1 %v394_v31, %s869_s1 }
 0xaec   :  { %v397_v34 = vpop.permute.xlu1 %396 }
 0xaed   :  { %v400_v36 = vmul.f32 %v902_v9, %v397_v34  ;;  %v399_v35 = vmul.f32 %v899_v7, %v397_v34  ;;  %v401_v39 = vmul.f32 %v904_v10, %v397_v34  ;;  %v402_v41 = vmul.f32 %v906_v11, %v397_v34 }
 0xaef   :  { %v406_v37 = vsel %vm141_vm3, %v400_v36, 0.0  ;;  %v403_v38 = vsel %vm141_vm3, %v399_v35, 0.0  ;;  %v409_v40 = vsel %vm141_vm3, %v401_v39, 0.0  ;;  %v412_v43 = vsel %vm141_vm3, %v402_v41, 0.0 }
 0xaf0   :  { %407 = vadd.xlane.f32.xlu1 %v406_v37  ;;  %404 = vadd.xlane.f32.xlu0 %v403_v38 }
 0xaf4   :  { %410 = vadd.xlane.f32.xlu0 %v409_v40 }
 0xaf8   :  { %413 = vadd.xlane.f32.xlu0 %v412_v43 }
 0xb79   :  { %v408_v44 = vpop.xlane.xlu1 %407  ;;  %v405_v45 = vpop.xlane.xlu0 %404 }
 0xb7a   :  { %v416_v46 = vmul.f32 %v408_v44, %v918_v24  ;;  %v415_v47 = vmul.f32 %v405_v45, %v916_v22 }
 0xb7c   :  { %v419_v51 = vadd.f32 %v416_v46, %v415_v47 }
 0xb7d   :  { %v411_v48 = vpop.xlane.xlu0 %410 }
 0xb7e   :  { %v417_v50 = vmul.f32 %v411_v48, %v922_v28 }
 0xb80   :  { %v420_v49 = vadd.f32 %v419_v51, %v417_v50 }
 0xb81   :  { %v414_v59 = vpop.xlane.xlu0 %413 }
 0xb82   :  { %v418_v52 = vmul.f32 %v414_v59, %v925_v32 }
 0xb84   :  { %v421_v53 = vadd.f32 %v420_v49, %v418_v52 }
 0xb86   :  { %v422_v54 = vrot.slane %v421_v53, 4 }
 0xb88   :  { %v423_v55 = vadd.f32 %v422_v54, %v421_v53 }
 0xb8a   :  { %v424_v56 = vrot.slane %v423_v55, 2 }
 0xb8c   :  { %v425_v57 = vadd.f32 %v424_v56, %v423_v55 }
 0xb8e   :  { %v426_v58 = vrot.slane %v425_v57, 1 }
 0xb90   :  { %v427_v60 = vadd.f32 %v426_v58, %v425_v57 }
 0xb92   :  { %v428_v61 = vadd.f32 %v427_v60, %v928_v42 }
 0xb94   :  { %v723_v62 = vmul.f32 -1.442695, %v428_v61 }
 0xb96   :  { %772 = vpow2.f32 %v723_v62 }
 0xba3   :  { %v773_v63 = vpop.eup %772 }
 0xba4   :  { %v432_v0 = vadd.f32 1.0, %v773_v63 }
 0xba6   :  { %774 = vrcp.f32 %v432_v0 }
 0xbb3   :  { %v775_v1 = vpop.eup %774 }
 0xbb4   :  { %v435_v3 = vmul.f32 2.0, %v775_v1  ;;  %v440_v12 = vmul.f32 %v775_v1, %v438_v8 }
 0xbb6   :  { %v724_v4 = vadd.f32 -1.0, %v435_v3  ;;  %v525_v3 = vsub.s32 5, %v893_v2 }
 0xbb8   :  { %442 = vrot.lane.b32.xlu0 %v724_v4, %s868_s0 }
 0xc2a   :  { %v443_v5 = vpop.permute.xlu0 %442 }
 0xc2b   :  { %v445_v6 = vmul.f32 %v775_v1, %v443_v5 }
 0xc2d   :  { %447 = vrot.lane.b32.xlu1 %v445_v6, %s869_s1 }
 0xc9f   :  { %v448_v13 = vpop.permute.xlu1 %447 }
 0xca0   :  { %v450_v14 = vadd.f32 %v448_v13, %v440_v12 }
 0xca2   :  { %776 = vtanh.f32 %v450_v14  ;;  %v504_v61 = vrot.slane %v450_v14, 7 }
 0xcaf   :  { %v777_v15 = vpop.eup %776 }
 0xcb0   :  { %453 = vrot.lane.b32.xlu1 %v777_v15, %s868_s0 }
 0xd22   :  { %v454_v17 = vpop.permute.xlu1 %453 }
 0xd23   :  { %v456_v18 = vmul.f32 %v775_v1, %v454_v17 }
 0xd25   :  { %v460_v19 = vrot.slane %v456_v18, %v459_v16  ;;  %v662_v20 = vsel %vm661_vm10, %v660_v33, %v456_v18 }
 0xd27   :  { %462 = vrot.lane.b32.xlu1 %v460_v19, %s869_s1 }
 0xd99   :  { %v463_v21 = vpop.permute.xlu1 %462 }
 0xd9a   :  { %v466_v23 = vmul.f32 %v902_v9, %v463_v21  ;;  %v465_v25 = vmul.f32 %v899_v7, %v463_v21  ;;  %v467_v29 = vmul.f32 %v904_v10, %v463_v21  ;;  %v468_v31 = vmul.f32 %v906_v11, %v463_v21 }
 0xd9c   :  { %v472_v26 = vsel %vm141_vm3, %v466_v23, 0.0  ;;  %v469_v27 = vsel %vm141_vm3, %v465_v25, 0.0  ;;  %v475_v30 = vsel %vm141_vm3, %v467_v29, 0.0  ;;  %v478_v33 = vsel %vm141_vm3, %v468_v31, 0.0 }
 0xd9d   :  { %473 = vadd.xlane.f32.xlu1 %v472_v26  ;;  %470 = vadd.xlane.f32.xlu0 %v469_v27 }
 0xda1   :  { %476 = vadd.xlane.f32.xlu0 %v475_v30 }
 0xda5   :  { %479 = vadd.xlane.f32.xlu0 %v478_v33 }
 0xe26   :  { %v474_v34 = vpop.xlane.xlu1 %473  ;;  %v471_v36 = vpop.xlane.xlu0 %470 }
 0xe27   :  { %v482_v35 = vmul.f32 %v474_v34, %v918_v24  ;;  %v481_v37 = vmul.f32 %v471_v36, %v916_v22 }
 0xe29   :  { %v485_v40 = vadd.f32 %v482_v35, %v481_v37 }
 0xe2a   :  { %v477_v38 = vpop.xlane.xlu0 %476 }
 0xe2b   :  { %v483_v39 = vmul.f32 %v477_v38, %v922_v28 }
 0xe2d   :  { %v486_v43 = vadd.f32 %v485_v40, %v483_v39 }
 0xe2e   :  { %v480_v41 = vpop.xlane.xlu0 %479 }
 0xe2f   :  { %v484_v44 = vmul.f32 %v480_v41, %v925_v32 }
 0xe31   :  { %v487_v45 = vadd.f32 %v486_v43, %v484_v44 }
 0xe33   :  { %v488_v46 = vrot.slane %v487_v45, 4 }
 0xe35   :  { %v489_v47 = vadd.f32 %v488_v46, %v487_v45 }
 0xe37   :  { %v490_v48 = vrot.slane %v489_v47, 2 }
 0xe39   :  { %v491_v50 = vadd.f32 %v490_v48, %v489_v47 }
 0xe3b   :  { %v492_v51 = vrot.slane %v491_v50, 1 }
 0xe3d   :  { %v493_v59 = vadd.f32 %v492_v51, %v491_v50 }
 0xe3f   :  { %v494_v49 = vadd.f32 %v493_v59, %v928_v42 }
 0xe41   :  { %v725_v52 = vmul.f32 -1.442695, %v494_v49 }
 0xe43   :  { %778 = vpow2.f32 %v725_v52 }
 0xe50   :  { %v779_v53 = vpop.eup %778 }
 0xe51   :  { %v498_v54 = vadd.f32 1.0, %v779_v53 }
 0xe53   :  { %780 = vrcp.f32 %v498_v54 }
 0xe60   :  { %v781_v55 = vpop.eup %780 }
 0xe61   :  { %v501_v56 = vmul.f32 2.0, %v781_v55  ;;  %v506_v62 = vmul.f32 %v781_v55, %v504_v61 }
 0xe63   :  { %v726_v57 = vadd.f32 -1.0, %v501_v56  ;;  %v591_v56 = vsub.s32 6, %v893_v2 }
 0xe65   :  { %508 = vrot.lane.b32.xlu0 %v726_v57, %s868_s0 }
 0xed7   :  { %v509_v58 = vpop.permute.xlu0 %508 }
 0xed8   :  { %v511_v60 = vmul.f32 %v781_v55, %v509_v58 }
 0xeda   :  { %513 = vrot.lane.b32.xlu1 %v511_v60, %s869_s1 }
 0xf4c   :  { %v514_v63 = vpop.permute.xlu1 %513 }
 0xf4d   :  { %v516_v0 = vadd.f32 %v514_v63, %v506_v62 }
 0xf4f   :  { %782 = vtanh.f32 %v516_v0  ;;  %v570_v49 = vrot.slane %v516_v0, 7 }
 0xf5c   :  { %v783_v1 = vpop.eup %782 }
 0xf5d   :  { %519 = vrot.lane.b32.xlu1 %v783_v1, %s868_s0 }
 0xfcf   :  { %v520_v4 = vpop.permute.xlu1 %519 }
 0xfd0   :  { %v522_v5 = vmul.f32 %v781_v55, %v520_v4 }
 0xfd2   :  { %v526_v6 = vrot.slane %v522_v5, %v525_v3  ;;  %v664_v8 = vsel %vm663_vm11, %v662_v20, %v522_v5 }
 0xfd4   :  { %528 = vrot.lane.b32.xlu1 %v526_v6, %s869_s1 }
0x1046   :  { %v529_v12 = vpop.permute.xlu1 %528 }
0x1047   :  { %v532_v13 = vmul.f32 %v902_v9, %v529_v12  ;;  %v531_v14 = vmul.f32 %v899_v7, %v529_v12  ;;  %v533_v17 = vmul.f32 %v904_v10, %v529_v12  ;;  %v534_v19 = vmul.f32 %v906_v11, %v529_v12 }
0x1049   :  { %v538_v15 = vsel %vm141_vm3, %v532_v13, 0.0  ;;  %v535_v16 = vsel %vm141_vm3, %v531_v14, 0.0  ;;  %v541_v18 = vsel %vm141_vm3, %v533_v17, 0.0  ;;  %v544_v20 = vsel %vm141_vm3, %v534_v19, 0.0 }
0x104a   :  { %539 = vadd.xlane.f32.xlu1 %v538_v15  ;;  %536 = vadd.xlane.f32.xlu0 %v535_v16 }
0x104e   :  { %542 = vadd.xlane.f32.xlu0 %v541_v18 }
0x1052   :  { %545 = vadd.xlane.f32.xlu0 %v544_v20 }
0x10d3   :  { %v540_v21 = vpop.xlane.xlu1 %539  ;;  %v537_v23 = vpop.xlane.xlu0 %536 }
0x10d4   :  { %v548_v25 = vmul.f32 %v540_v21, %v918_v24  ;;  %v547_v26 = vmul.f32 %v537_v23, %v916_v22 }
0x10d6   :  { %v551_v30 = vadd.f32 %v548_v25, %v547_v26 }
0x10d7   :  { %v543_v27 = vpop.xlane.xlu0 %542 }
0x10d8   :  { %v549_v29 = vmul.f32 %v543_v27, %v922_v28 }
0x10da   :  { %v552_v33 = vadd.f32 %v551_v30, %v549_v29 }
0x10db   :  { %v546_v31 = vpop.xlane.xlu0 %545 }
0x10dc   :  { %v550_v34 = vmul.f32 %v546_v31, %v925_v32 }
0x10de   :  { %v553_v36 = vadd.f32 %v552_v33, %v550_v34 }
0x10e0   :  { %v554_v35 = vrot.slane %v553_v36, 4 }
0x10e2   :  { %v555_v37 = vadd.f32 %v554_v35, %v553_v36 }
0x10e4   :  { %v556_v38 = vrot.slane %v555_v37, 2 }
0x10e6   :  { %v557_v39 = vadd.f32 %v556_v38, %v555_v37  ;;  %v669_v37 = vld [vmem:[#allocation5 + $0x28] sm:$0xff] }
0x10e8   :  { %v558_v40 = vrot.slane %v557_v39, 1 }
0x10ea   :  { %v559_v41 = vadd.f32 %v558_v40, %v557_v39 }
0x10ec   :  { %v560_v43 = vadd.f32 %v559_v41, %v928_v42 }
0x10ee   :  { %v727_v44 = vmul.f32 -1.442695, %v560_v43 }
0x10f0   :  { %784 = vpow2.f32 %v727_v44 }
0x10fd   :  { %v785_v45 = vpop.eup %784 }
0x10fe   :  { %v564_v46 = vadd.f32 1.0, %v785_v45 }
0x1100   :  { %786 = vrcp.f32 %v564_v46 }
0x110d   :  { %v787_v47 = vpop.eup %786 }
0x110e   :  { %v567_v48 = vmul.f32 2.0, %v787_v47  ;;  %v572_v52 = vmul.f32 %v787_v47, %v570_v49 }
0x1110   :  { %v728_v50 = vadd.f32 -1.0, %v567_v48 }
0x1112   :  { %574 = vrot.lane.b32.xlu0 %v728_v50, %s868_s0 }
0x1184   :  { %v575_v51 = vpop.permute.xlu0 %574 }
0x1185   :  { %v577_v59 = vmul.f32 %v787_v47, %v575_v51 }
0x1187   :  { %579 = vrot.lane.b32.xlu1 %v577_v59, %s869_s1 }
0x11f9   :  { %v580_v53 = vpop.permute.xlu1 %579 }
0x11fa   :  { %v582_v54 = vadd.f32 %v580_v53, %v572_v52  ;;  %v690_v52 = vld [vmem:[#allocation5 + $0x30] sm:$0x1] }
0x11fc   :  { %788 = vtanh.f32 %v582_v54  ;;  %v636_v33 = vrot.slane %v582_v54, 7 }
0x1209   :  { %v789_v55 = vpop.eup %788 }
0x120a   :  { %585 = vrot.lane.b32.xlu1 %v789_v55, %s868_s0 }
0x127c   :  { %v586_v57 = vpop.permute.xlu1 %585 }
0x127d   :  { %v588_v58 = vmul.f32 %v787_v47, %v586_v57 }
0x127f   :  { %v592_v60 = vrot.slane %v588_v58, %v591_v56  ;;  %v666_v61 = vsel %vm665_vm12, %v664_v8, %v588_v58 }
0x1281   :  { %594 = vrot.lane.b32.xlu1 %v592_v60, %s869_s1 }
0x12f3   :  { %v595_v62 = vpop.permute.xlu1 %594 }
0x12f4   :  { %v598_v63 = vmul.f32 %v902_v9, %v595_v62  ;;  %v597_v0 = vmul.f32 %v899_v7, %v595_v62  ;;  %v599_v4 = vmul.f32 %v904_v10, %v595_v62  ;;  %v600_v5 = vmul.f32 %v906_v11, %v595_v62 }
0x12f6   :  { %v604_v1 = vsel %vm141_vm3, %v598_v63, 0.0  ;;  %v601_v3 = vsel %vm141_vm3, %v597_v0, 0.0  ;;  %v607_v2 = vsel %vm141_vm3, %v599_v4, 0.0  ;;  %v610_v6 = vsel %vm141_vm3, %v600_v5, 0.0 }
0x12f7   :  { %605 = vadd.xlane.f32.xlu1 %v604_v1  ;;  %602 = vadd.xlane.f32.xlu0 %v601_v3 }
0x12fb   :  { %608 = vadd.xlane.f32.xlu0 %v607_v2 }
0x12ff   :  { %611 = vadd.xlane.f32.xlu0 %v610_v6 }
0x1380   :  { %v606_v8 = vpop.xlane.xlu1 %605  ;;  %v603_v9 = vpop.xlane.xlu0 %602 }
0x1381   :  { %v614_v7 = vmul.f32 %v606_v8, %v918_v24  ;;  %v613_v12 = vmul.f32 %v603_v9, %v916_v22 }
0x1383   :  { %v617_v10 = vadd.f32 %v614_v7, %v613_v12 }
0x1384   :  { %v609_v13 = vpop.xlane.xlu0 %608 }
0x1385   :  { %v615_v14 = vmul.f32 %v609_v13, %v922_v28 }
0x1387   :  { %v618_v16 = vadd.f32 %v617_v10, %v615_v14 }
0x1388   :  { %v612_v15 = vpop.xlane.xlu0 %611 }
0x1389   :  { %v616_v17 = vmul.f32 %v612_v15, %v925_v32 }
0x138b   :  { %v619_v18 = vadd.f32 %v618_v16, %v616_v17 }
0x138d   :  { %v620_v11 = vrot.slane %v619_v18, 4 }
0x138f   :  { %v621_v19 = vadd.f32 %v620_v11, %v619_v18 }
0x1391   :  { %v622_v20 = vrot.slane %v621_v19, 2 }
0x1393   :  { %v623_v21 = vadd.f32 %v622_v20, %v621_v19 }
0x1395   :  { %v624_v23 = vrot.slane %v623_v21, 1 }
0x1397   :  { %v625_v25 = vadd.f32 %v624_v23, %v623_v21 }
0x1399   :  { %v626_v26 = vadd.f32 %v625_v25, %v928_v42 }
0x139b   :  { %v729_v24 = vmul.f32 -1.442695, %v626_v26 }
0x139d   :  { %790 = vpow2.f32 %v729_v24 }
0x13aa   :  { %v791_v22 = vpop.eup %790 }
0x13ab   :  { %v630_v27 = vadd.f32 1.0, %v791_v22 }
0x13ad   :  { %792 = vrcp.f32 %v630_v27 }
0x13ba   :  { %v793_v28 = vpop.eup %792 }
0x13bb   :  { %v633_v29 = vmul.f32 2.0, %v793_v28  ;;  %v638_v34 = vmul.f32 %v793_v28, %v636_v33 }
0x13bd   :  { %v730_v30 = vadd.f32 -1.0, %v633_v29 }
0x13bf   :  { %640 = vrot.lane.b32.xlu0 %v730_v30, %s868_s0 }
0x1431   :  { %v641_v32 = vpop.permute.xlu0 %640 }
0x1432   :  { %v643_v31 = vmul.f32 %v793_v28, %v641_v32 }
0x1434   :  { %645 = vrot.lane.b32.xlu1 %v643_v31, %s869_s1 }
0x14a6   :  { %v646_v36 = vpop.permute.xlu1 %645 }
0x14a7   :  { %v648_v35 = vadd.f32 %v646_v36, %v638_v34 }
0x14a9   :  { %794 = vtanh.f32 %v648_v35 }
0x14b6   :  { %v795_v42 = vpop.eup %794 }
0x14b7   :  { %651 = vrot.lane.b32.xlu1 %v795_v42, %s868_s0 }
0x14bb   :  { %671 = vrot.lane.b32.xlu1 %v669_v37, %s870_s21 }
0x1529   :  { %v652_v38 = vpop.permute.xlu1 %651 }
0x152a   :  { %v654_v39 = vmul.f32 %v793_v28, %v652_v38 }
0x152c   :  { %v668_v40 = vsel %vm667_vm13, %v666_v61, %v654_v39 }
0x152d   :  { %v672_v41 = vpop.permute.xlu1 %671 }
0x152e   :  { %v674_v43 = vmul.f32 %v672_v41, %v668_v40 }
0x1530   :  { %v676_v44 = vsel %vm675_vm14, %v674_v43, 0.0 }
0x1531   :  { %v677_v45 = vrot.slane %v676_v44, 4 }
0x1533   :  { %v678_v46 = vadd.f32 %v677_v45, %v676_v44 }
0x1535   :  { %v679_v47 = vrot.slane %v678_v46, 2 }
0x1537   :  { %v680_v48 = vadd.f32 %v679_v47, %v678_v46 }
0x1539   :  { %v681_v50 = vrot.slane %v680_v48, 1 }
0x153b   :  { %v682_v51 = vadd.f32 %v681_v50, %v680_v48 }
0x153d   :  { %684 = vrot.lane.b32.xlu0 %v682_v51, %s869_s1 }
0x15af   :  { %v685_v59 = vpop.permute.xlu0 %684 }
0x15b0   :  { %v687_v49 = vsel %vm141_vm3, %v685_v59, 0.0 }
0x15b1   :  { %688 = vadd.xlane.f32.xlu1 %v687_v49 }
0x163a   :  { %v689_v53 = vpop.xlane.xlu1 %688 }
0x163b   :  { %v691_v54 = vadd.f32 %v690_v52, %v689_v53 }
0x163d   :  { %693 = vst.msk [vmem:[#allocation7] sm:$0x1] %vm692_vm15, %v691_v54 }
0x163e   :  { %847 = shalt.err (!%p844_p0)
}
0x163f   :  { %703 = dma.vmem_to_hbm [thread:$0]  %s701_s23, 16, %s1071_s2, [#allocation4]  }
0x1640   :  { %860 = dma.done.wait [#allocation4], 16  }
0x1641   :  { %861 = vsyncadd [#allocation4], 4294967280 }
0x1642   :  { %707 = vsyncpa [#allocation3], 1 }
0x1643   :  { %708 = vsyncpa [#allocation6], 1 }
0x1644   :  { %709 = vsyncpa [#allocation4], 1 }

</bundles_post_ra>
